<compile_context>
chip_gen: v5e
topology: v5e:2x2
jax: 0.10.0
libtpu: 0.0.40
codegen_flags: <defaults>
</compile_context>

<pallas_src>
import functools

import jax
import jax.numpy as jnp
from jax.experimental import pallas as pl
from jax.experimental.pallas import tpu as pltpu

LANE = 128   # TPU lane width; the padded class dim of the lane-dense output


# --------------------------- fused Pallas kernel -----------------------------

def _lora_fused_kernel(x_ref, w_eff_ref, bias_ref, span_ref, labels_ref,
                       w_cls_ref, b_cls_ref, out_ref, *, n_cls):
    """One grid step: encoder + masked max-pool + pair classifier + CE.

    Per-block shapes:
      x_ref      [BB*S, H]     bf16  encoder input rows for BB base batch rows
      w_eff_ref  [H, H]        bf16  LoRA-folded encoder weight
      bias_ref   [1, H]        f32
      span_ref   [BB, TD, S]   bf16  binary span masks
      labels_ref [BB*TD/2, 1]  i32   per-pair labels
      w_cls_ref  [2H, 128]     bf16  classifier weight, zero-padded past n_cls
      b_cls_ref  [1, 128]      f32   classifier bias, -1e30-padded past n_cls
      out_ref    [BB*TD/2,128] f32   cols [0,n_cls)=logits, col n_cls=CE loss
    """
    bb, td, s = span_ref.shape
    h = x_ref.shape[1]
    rows = td // 2
    n_pairs = bb * rows
    lane = out_ref.shape[1]

    # --- encoder (LoRA already folded into W_eff): lhs = tanh(x @ W_eff + b).
    # One MXU push for the whole block (bf16 operands, f32 accumulation).
    lhs = jnp.tanh(
        jnp.dot(x_ref[...], w_eff_ref[...], preferred_element_type=jnp.float32)
        + bias_ref[...])                                       # [BB*S, H] f32

    # --- masked max-pool over the sequence.  repeat_interleave is folded by
    # broadcasting lhs over TD; the complementary mask is recomputed in-kernel
    # as -1e4*(1-span) instead of being streamed from HBM.
    span = span_ref[...].astype(jnp.float32)[..., None]        # [BB,TD,S,1]
    lhs4 = lhs.reshape(bb, 1, s, h)                            # [BB,1,S,H]
    tmp = lhs4 * span + (-1e4) * (1.0 - span)                  # [BB,TD,S,H]
    pooled = jnp.max(tmp, axis=2)                              # [BB,TD,H] f32
    # TODO(synk): for large TD*S*H replace the broadcasted temporary with a
    # fori_loop running max over TD to bound the live set to [S,H]+[TD,H].

    # --- pair-concat == row-major reshape (concat(pooled[2p], pooled[2p+1]));
    # one lane-dense classifier matmul against the padded [2H, 128] weight.
    paired = pooled.reshape(n_pairs, 2 * h).astype(jnp.bfloat16)
    logits_pad = (jnp.dot(paired, w_cls_ref[...],
                          preferred_element_type=jnp.float32)
                  + b_cls_ref[...])                            # [n_pairs, 128]

    # --- per-pair cross-entropy (stable logsumexp).  Padded columns carry a
    # -1e30 bias, so they never win the max and their exp() underflows to 0.
    m = jnp.max(logits_pad, axis=-1, keepdims=True)
    lse = m + jnp.log(jnp.sum(jnp.exp(logits_pad - m), axis=-1, keepdims=True))
    col = jax.lax.broadcasted_iota(jnp.int32, (n_pairs, lane), 1)
    picked = jnp.sum(jnp.where(col == labels_ref[...], logits_pad, 0.0),
                     axis=-1, keepdims=True)                   # [n_pairs, 1]
    loss_pp = lse - picked                                     # [n_pairs, 1]

    # --- single lane-dense store: logits in cols [0, n_cls), per-pair CE in
    # column n_cls (remaining padded cols keep filler; wrapper slices them off).
    out_ref[...] = jnp.where(col == n_cls, loss_pp, logits_pad)


# ------------------------------ Wrapper ---------------------------------------

def lora_model_forward(params, input_ids, attention_mask, labels,
                       span_mask, complementary_mask, to_duplicate):
    # NOTE: complementary_mask is assumed to be the standard -1e4*(1-span_mask)
    # companion of span_mask (as produced by the ICL_and_FT pipeline); it is
    # recomputed in-kernel instead of streamed, removing one HBM input.
    del complementary_mask
    b, s = input_ids.shape
    h = params["emb"].shape[1]
    n_cls = params["w_cls"].shape[1]
    td = int(to_duplicate)
    assert td % 2 == 0, "pairs must not straddle base batch rows"
    assert n_cls < LANE, "per-pair CE is packed into column n_cls of the slab"
    rows = td // 2
    p = b * rows                       # number of classification pairs

    # Collapse the (small) batch into a single grid step: per-step pipeline
    # overhead (~0.35us) dominates at these shapes.  At larger batch, choose
    # block_b < b so the "parallel" axis still splits over v7x's two TCs while
    # each step keeps a substantial MXU M dimension.
    block_b = b
    n_steps = b // block_b
    bp = block_b * rows                # pairs handled per grid step

    # Backbone stub: embedding gather + attention-mask gating (stays in JAX),
    # streamed to the kernel as bf16 — the dtype the MXU consumes anyway.
    x = (params["emb"][input_ids]
         * attention_mask[..., None].astype(jnp.float32))
    x = x.reshape(b * s, h).astype(jnp.bfloat16)

    # Fold LoRA into the base weight in f32 (A@B is Hxr x rxH, trivial) and
    # cast the folded weight to bf16 only at the MXU boundary.
    w_eff = (params["w_enc"]
             + params["a_lora"] @ params["b_lora"]).astype(jnp.bfloat16)

    # Pad the classifier to a lane-dense 128-wide slab: zero weights and a
    # very negative bias past n_cls make the padded columns inert in the CE.
    w_cls_pad = (jnp.zeros((2 * h, LANE), jnp.float32)
                 .at[:, :n_cls].set(params["w_cls"]).astype(jnp.bfloat16))
    b_cls_pad = (jnp.full((1, LANE), -1e30, jnp.float32)
                 .at[:, :n_cls].set(params["b_cls"]))

    # [N, S] -> [B, TD, S]; binary mask streamed as bf16 (exact for 0/1).
    span3 = span_mask.reshape(b, td, s).astype(jnp.bfloat16)
    labels_v = labels.reshape(p, 1).astype(jnp.int32)

    grid_spec = pltpu.PrefetchScalarGridSpec(
        num_scalar_prefetch=0,
        grid=(n_steps,),
        in_specs=[
            pl.BlockSpec((block_b * s, h), lambda i: (i, 0)),      # x rows
            # Constant-index weight blocks are fetched once (single grid step);
            # when the grid grows and H scales, mark these Buffered(1) so they
            # are not double-buffered under v7x's 64 MiB VMEM.
            pl.BlockSpec((h, h), lambda i: (0, 0)),                # W_eff
            pl.BlockSpec((1, h), lambda i: (0, 0)),                # enc bias
            pl.BlockSpec((block_b, td, s), lambda i: (i, 0, 0)),   # span mask
            pl.BlockSpec((bp, 1), lambda i: (i, 0)),               # labels
            pl.BlockSpec((2 * h, LANE), lambda i: (0, 0)),         # W_cls pad
            pl.BlockSpec((1, LANE), lambda i: (0, 0)),             # cls bias
        ],
        out_specs=pl.BlockSpec((bp, LANE), lambda i: (i, 0)),      # logit+CE slab
    )

    out = pl.pallas_call(
        functools.partial(_lora_fused_kernel, n_cls=n_cls),
        grid_spec=grid_spec,
        out_shape=jax.ShapeDtypeStruct((p, LANE), jnp.float32),
        compiler_params=pltpu.CompilerParams(
            dimension_semantics=("parallel",)),   # v7x: 2 TCs split batch blocks
    )(x, w_eff, params["bias_enc"], span3, labels_v, w_cls_pad, b_cls_pad)

    logits = out[:, :n_cls]                        # [P, C]
    loss = jnp.mean(out[:, n_cls])                 # nn.CrossEntropyLoss (mean)
    # TODO(synk): torch's `.cpu()` move before the loss has no Pallas analogue.
    return loss, logits


def init_params(key, vocab=50, hidden=32, rank=4, num_classes=4):
    ks = jax.random.split(key, 5)
    sc = 0.02
    return {
        "emb":      jax.random.normal(ks[0], (vocab, hidden), jnp.float32) * sc,
        "w_enc":    jax.random.normal(ks[1], (hidden, hidden), jnp.float32) * sc,
        "a_lora":   jax.random.normal(ks[2], (hidden, rank), jnp.float32) * sc,
        "b_lora":   jax.random.normal(ks[3], (rank, hidden), jnp.float32) * sc,
        "bias_enc": jnp.zeros((1, hidden), jnp.float32),
        "w_cls":    jax.random.normal(ks[4], (2 * hidden, num_classes), jnp.float32) * sc,
        "b_cls":    jnp.zeros((1, num_classes), jnp.float32),
    }


# ------------------------------- Main ---------------------------------------

if __name__ == "__main__":
    B, S, H, C, V, RANK = 2, 8, 32, 4, 50, 4
    to_duplicate = 2                 # each example duplicated twice (span pairs)
    N = B * to_duplicate             # 4 duplicated rows
    P = N // 2                       # 2 classification examples

    params = init_params(jax.random.PRNGKey(0), vocab=V, hidden=H,
                         rank=RANK, num_classes=C)

    k1, k2, k3 = jax.random.split(jax.random.PRNGKey(1), 3)
    input_ids = jax.random.randint(k1, (B, S), 0, V)
    attention_mask = jnp.ones((B, S), jnp.int32)
    span_mask = (jax.random.uniform(k2, (N, S)) > 0.5).astype(jnp.float32)
    span_mask = span_mask.at[:, 0].set(1.0)          # ensure non-empty spans
    complementary_mask = -1e4 * (1.0 - span_mask)
    labels = jax.random.randint(k3, (P,), 0, C)

    fwd = jax.jit(lora_model_forward, static_argnums=(6,))
    loss, logits = fwd(params, input_ids, attention_mask, labels,
                       span_mask, complementary_mask, to_duplicate)
    jax.block_until_ready((loss, logits))

    # Pure-JAX f32 reference check of the same semantics.
    emb = params["emb"][input_ids] * attention_mask[..., None].astype(jnp.float32)
    x_r = emb.reshape(B * S, H)
    lhs_r = jnp.tanh(x_r @ params["w_enc"]
                     + (x_r @ params["a_lora"]) @ params["b_lora"]
                     + params["bias_enc"]).reshape(B, S, H)
    dup = jnp.repeat(lhs_r, to_duplicate, axis=0)
    tmp = dup * span_mask[:, :, None] + complementary_mask[:, :, None]
    pooled_r = tmp.max(axis=1)
    rp = pooled_r.reshape(P, 2, H)
    new_pooled_r = jnp.concatenate([rp[:, 0], rp[:, 1]], axis=1)
    logits_r = new_pooled_r @ params["w_cls"] + params["b_cls"]
    lse_r = jax.nn.logsumexp(logits_r, axis=-1)
    loss_r = jnp.mean(lse_r - logits_r[jnp.arange(P), labels])

    assert jnp.allclose(logits, logits_r, atol=1e-3, rtol=1e-3)
    assert jnp.allclose(loss, loss_r, atol=1e-3, rtol=1e-3)

    print("KERNEL_OK")
</pallas_src>

<mosaic_0001>
module attributes {stable_mosaic.version = 11 : i64} {
  func.func @_lora_fused_kernel(%arg0: i32, %arg1: memref<16x32xbf16, #tpu.memory_space<vmem>>, %arg2: memref<32x32xbf16, #tpu.memory_space<vmem>>, %arg3: memref<1x32xf32, #tpu.memory_space<vmem>>, %arg4: memref<2x2x8xbf16, #tpu.memory_space<vmem>>, %arg5: memref<2x1xi32, #tpu.memory_space<vmem>>, %arg6: memref<64x128xbf16, #tpu.memory_space<vmem>>, %arg7: memref<1x128xf32, #tpu.memory_space<vmem>>, %arg8: memref<2x128xf32, #tpu.memory_space<vmem>>) attributes {dimension_semantics = [#tpu.dimension_semantics<parallel>], iteration_bounds = array<i64: 1>, scalar_prefetch = 0 : i64, scratch_operands = 0 : i64, tpu.core_type = #tpu.core_type<tc>, window_params = [{transform_indices = @transform_0, window_bounds = array<i64: 16, 32>}, {pipeline_mode = #tpu.pipeline_mode<synchronous>, transform_indices = @transform_1, window_bounds = array<i64: 32, 32>}, {pipeline_mode = #tpu.pipeline_mode<synchronous>, transform_indices = @transform_2, window_bounds = array<i64: 1, 32>}, {transform_indices = @transform_3, window_bounds = array<i64: 2, 2, 8>}, {transform_indices = @transform_4, window_bounds = array<i64: 2, 1>}, {pipeline_mode = #tpu.pipeline_mode<synchronous>, transform_indices = @transform_5, window_bounds = array<i64: 64, 128>}, {pipeline_mode = #tpu.pipeline_mode<synchronous>, transform_indices = @transform_6, window_bounds = array<i64: 1, 128>}, {transform_indices = @transform_7, window_bounds = array<i64: 2, 128>}]} {
    %c0 = arith.constant 0 : index
    %c0_0 = arith.constant 0 : index
    %0 = vector.load %arg1[%c0, %c0_0] : memref<16x32xbf16, #tpu.memory_space<vmem>>, vector<16x32xbf16>
    %c0_1 = arith.constant 0 : index
    %c0_2 = arith.constant 0 : index
    %1 = vector.load %arg2[%c0_1, %c0_2] : memref<32x32xbf16, #tpu.memory_space<vmem>>, vector<32x32xbf16>
    %cst = arith.constant dense<0.000000e+00> : vector<16x32xf32>
    %2 = tpu.matmul %0, %1, %cst {dimension_numbers = #tpu.dot_dimension_numbers<[1], [0], [0], [1], [0, 0, 1, 1], [], []>} : vector<16x32xbf16>, vector<32x32xbf16>, vector<16x32xf32> -> vector<16x32xf32>
    %c0_3 = arith.constant 0 : index
    %c0_4 = arith.constant 0 : index
    %3 = vector.load %arg3[%c0_3, %c0_4] : memref<1x32xf32, #tpu.memory_space<vmem>>, vector<1x32xf32>
    %4 = vector.broadcast %3 : vector<1x32xf32> to vector<16x32xf32>
    %5 = arith.addf %2, %4 : vector<16x32xf32>
    %6 = math.tanh %5 : vector<16x32xf32>
    %c0_5 = arith.constant 0 : index
    %c0_6 = arith.constant 0 : index
    %c0_7 = arith.constant 0 : index
    %7 = vector.load %arg4[%c0_5, %c0_6, %c0_7] : memref<2x2x8xbf16, #tpu.memory_space<vmem>>, vector<2x2x8xbf16>
    %8 = arith.extf %7 : vector<2x2x8xbf16> to vector<2x2x8xf32>
    %9 = vector.shape_cast %8 : vector<2x2x8xf32> to vector<2x2x8x1xf32>
    %10 = vector.shape_cast %6 : vector<16x32xf32> to vector<2x1x8x32xf32>
    %11 = vector.broadcast %10 : vector<2x1x8x32xf32> to vector<2x2x8x32xf32>
    %12 = vector.broadcast %9 : vector<2x2x8x1xf32> to vector<2x2x8x32xf32>
    %13 = arith.mulf %11, %12 : vector<2x2x8x32xf32>
    %cst_8 = arith.constant 1.000000e+00 : f32
    %14 = vector.broadcast %cst_8 : f32 to vector<2x2x8x1xf32>
    %15 = arith.subf %14, %9 : vector<2x2x8x1xf32>
    %cst_9 = arith.constant -1.000000e+04 : f32
    %16 = vector.broadcast %cst_9 : f32 to vector<2x2x8x1xf32>
    %17 = arith.mulf %16, %15 : vector<2x2x8x1xf32>
    %18 = vector.broadcast %17 : vector<2x2x8x1xf32> to vector<2x2x8x32xf32>
    %19 = arith.addf %13, %18 : vector<2x2x8x32xf32>
    %cst_10 = arith.constant dense<0xFF800000> : vector<2x2x32xf32>
    %20 = vector.multi_reduction <maximumf>, %19, %cst_10 [2] : vector<2x2x8x32xf32> to vector<2x2x32xf32>
    %21 = vector.shape_cast %20 : vector<2x2x32xf32> to vector<2x64xf32>
    %22 = arith.truncf %21 : vector<2x64xf32> to vector<2x64xbf16>
    %c0_11 = arith.constant 0 : index
    %c0_12 = arith.constant 0 : index
    %23 = vector.load %arg6[%c0_11, %c0_12] : memref<64x128xbf16, #tpu.memory_space<vmem>>, vector<64x128xbf16>
    %cst_13 = arith.constant dense<0.000000e+00> : vector<2x128xf32>
    %24 = tpu.matmul %22, %23, %cst_13 {dimension_numbers = #tpu.dot_dimension_numbers<[1], [0], [0], [1], [0, 0, 1, 1], [], []>} : vector<2x64xbf16>, vector<64x128xbf16>, vector<2x128xf32> -> vector<2x128xf32>
    %c0_14 = arith.constant 0 : index
    %c0_15 = arith.constant 0 : index
    %25 = vector.load %arg7[%c0_14, %c0_15] : memref<1x128xf32, #tpu.memory_space<vmem>>, vector<1x128xf32>
    %26 = vector.broadcast %25 : vector<1x128xf32> to vector<2x128xf32>
    %27 = arith.addf %24, %26 : vector<2x128xf32>
    %cst_16 = arith.constant dense<0xFF800000> : vector<2xf32>
    %28 = vector.multi_reduction <maximumf>, %27, %cst_16 [1] : vector<2x128xf32> to vector<2xf32>
    %29 = vector.shape_cast %28 : vector<2xf32> to vector<2x1xf32>
    %30 = vector.broadcast %29 : vector<2x1xf32> to vector<2x128xf32>
    %31 = arith.subf %27, %30 : vector<2x128xf32>
    %32 = math.exp %31 : vector<2x128xf32>
    %cst_17 = arith.constant dense<0.000000e+00> : vector<2xf32>
    %33 = vector.multi_reduction <add>, %32, %cst_17 [1] : vector<2x128xf32> to vector<2xf32>
    %34 = vector.shape_cast %33 : vector<2xf32> to vector<2x1xf32>
    %35 = math.log %34 : vector<2x1xf32>
    %36 = arith.addf %29, %35 : vector<2x1xf32>
    %37 = tpu.iota {dimensions = array<i32: 1>} : vector<2x128xi32>
    %c0_18 = arith.constant 0 : index
    %c0_19 = arith.constant 0 : index
    %38 = vector.load %arg5[%c0_18, %c0_19] : memref<2x1xi32, #tpu.memory_space<vmem>>, vector<2x1xi32>
    %39 = vector.broadcast %38 : vector<2x1xi32> to vector<2x128xi32>
    %40 = arith.cmpi eq, %37, %39 : vector<2x128xi32>
    %cst_20 = arith.constant 0.000000e+00 : f32
    %41 = vector.broadcast %cst_20 : f32 to vector<2x128xf32>
    %42 = arith.select %40, %27, %41 : vector<2x128xi1>, vector<2x128xf32>
    %cst_21 = arith.constant dense<0.000000e+00> : vector<2xf32>
    %43 = vector.multi_reduction <add>, %42, %cst_21 [1] : vector<2x128xf32> to vector<2xf32>
    %44 = vector.shape_cast %43 : vector<2xf32> to vector<2x1xf32>
    %45 = arith.subf %36, %44 : vector<2x1xf32>
    %c4_i32 = arith.constant 4 : i32
    %46 = vector.broadcast %c4_i32 : i32 to vector<2x128xi32>
    %47 = arith.cmpi eq, %37, %46 : vector<2x128xi32>
    %48 = vector.shape_cast %45 : vector<2x1xf32> to vector<2x1xf32>
    %49 = vector.broadcast %48 : vector<2x1xf32> to vector<2x128xf32>
    %50 = arith.select %47, %49, %27 : vector<2x128xi1>, vector<2x128xf32>
    %c0_22 = arith.constant 0 : index
    %c0_23 = arith.constant 0 : index
    %51 = vector.load %arg8[%c0_22, %c0_23] : memref<2x128xf32, #tpu.memory_space<vmem>>, vector<2x128xf32>
    tpu.vector_store %arg8[%c0_22, %c0_23], %50 {strides = array<i32>} : memref<2x128xf32, #tpu.memory_space<vmem>>, vector<2x128xf32>,
    return
  }
  func.func @transform_0(%arg0: i32) -> (i32, i32) {
    %c0_i32 = arith.constant 0 : i32
    %c0_i32_0 = arith.constant 0 : i32
    return %arg0, %c0_i32 : i32, i32
  }
  func.func @transform_1(%arg0: i32) -> (i32, i32) {
    %c0_i32 = arith.constant 0 : i32
    %c0_i32_0 = arith.constant 0 : i32
    %c0_i32_1 = arith.constant 0 : i32
    return %c0_i32, %c0_i32_0 : i32, i32
  }
  func.func @transform_2(%arg0: i32) -> (i32, i32) {
    %c0_i32 = arith.constant 0 : i32
    %c0_i32_0 = arith.constant 0 : i32
    %c0_i32_1 = arith.constant 0 : i32
    return %c0_i32, %c0_i32_0 : i32, i32
  }
  func.func @transform_3(%arg0: i32) -> (i32, i32, i32) {
    %c0_i32 = arith.constant 0 : i32
    %c0_i32_0 = arith.constant 0 : i32
    %c0_i32_1 = arith.constant 0 : i32
    return %arg0, %c0_i32, %c0_i32_0 : i32, i32, i32
  }
  func.func @transform_4(%arg0: i32) -> (i32, i32) {
    %c0_i32 = arith.constant 0 : i32
    %c0_i32_0 = arith.constant 0 : i32
    return %arg0, %c0_i32 : i32, i32
  }
  func.func @transform_5(%arg0: i32) -> (i32, i32) {
    %c0_i32 = arith.constant 0 : i32
    %c0_i32_0 = arith.constant 0 : i32
    %c0_i32_1 = arith.constant 0 : i32
    return %c0_i32, %c0_i32_0 : i32, i32
  }
  func.func @transform_6(%arg0: i32) -> (i32, i32) {
    %c0_i32 = arith.constant 0 : i32
    %c0_i32_0 = arith.constant 0 : i32
    %c0_i32_1 = arith.constant 0 : i32
    return %c0_i32, %c0_i32_0 : i32, i32
  }
  func.func @transform_7(%arg0: i32) -> (i32, i32) {
    %c0_i32 = arith.constant 0 : i32
    %c0_i32_0 = arith.constant 0 : i32
    return %arg0, %c0_i32 : i32, i32
  }
}

</mosaic_0001>

<bundles_post_ra>
// kernel: lora_model_forward.1
= control target key start
LH: loop header
LB: loop body
LE: loop exit
PB: predicated region body
PF: predicated region fallthrough
CT: control target
= control target key end

     0   :  { %v79_v0 = vlaneseq  ;;  %vm54_vm0 = vcmask 261120   ;;  %vm154_vm1 = vcmask 1041409   ;;  %vm160_vm2 = vcmask 1047556   ;;  %s323_s15 = smov 32   ;;  %s412_s1 = inlined_call_operand.vmem [shape: bf16[32,32], index: 1, kind: input, shape index: {}]   ;;  %s413_s3 = inlined_call_operand.vmem [shape: bf16[2,2,8], index: 3, kind: input, shape index: {}]   ;;  %s414_s0 = inlined_call_operand.vmem [shape: bf16[16,32], index: 0, kind: input, shape index: {}]   ;;  %s415_s2 = inlined_call_operand.vmem [shape: f32[1,32], index: 2, kind: input, shape index: {}]   ;;  %s416_s5 = inlined_call_operand.vmem [shape: bf16[64,128], index: 5, kind: input, shape index: {}]   ;;  %s417_s6 = inlined_call_operand.vmem [shape: f32[1,128], index: 6, kind: input, shape index: {}]   ;;  %s418_s4 = inlined_call_operand.vmem [shape: s32[2,1], index: 4, kind: input, shape index: {}]   ;;  %s419_s7 = inlined_call_operand.vmem [shape: f32[2,128], index: 7, kind: output, shape index: {}]  }
   0x1   :  { %v291_v1 = vld [vmem:[%s412_s1 + $0x8] sm:$0xff]  ;;  %v75_v3 = vld [vmem:[%s413_s3 + $0x1] sm:$0x1]  ;;  %v74_v8 = vld [vmem:[%s413_s3] sm:$0x1]  ;;  %vm210_vm3 = vcmask 523264  }
   0x2   :  { %v80_v2 = vshrl.u32 %v79_v0, 7  ;;  %64 = vmatpush.bf16.msra.mxu0 %v291_v1  ;;  %v290_v4 = vld [vmem:[%s412_s1] sm:$0xff]  ;;  %v77_v5 = vunpack.c.l.bf16 %v75_v3  ;;  %v76_v11 = vunpack.c.l.bf16 %v74_v8  ;;  %v295_v35 = vld [vmem:[%s416_s5 + $0x18] sm:$0xff]  ;;  %v294_v40 = vld [vmem:[%s416_s5 + $0x10] sm:$0xff]  ;;  %v322_v8 = vmov 1934713408  }
   0x3   :  { %v289_v9 = vld [vmem:[%s414_s0] sm:$0xff]  ;;  %218 = vmatpush.bf16.msra.mxu1 %v295_v35  ;;  %v293_v50 = vld [vmem:[%s416_s5 + $0x8] sm:$0xff]  ;;  %vm227_vm5 = vcmask 1041408  }
   0x4   :  { %299 = vset.pattern.permute.xlu0 %v80_v2  ;;  %v92_v6 = vperm.slane %v77_v5, 0  ;;  %v99_v7 = vperm.slane %v77_v5, 1  ;;  %v78_v12 = vperm.slane %v76_v11, 0  ;;  %v85_v13 = vperm.slane %v76_v11, 1  ;;  %v312_v16 = vld [vmem:[%s415_s2] ss:$0 sm:$0xff] }
   0x6   :  { %65 = vmatpush.bf16.msra.mxu0 %v290_v4  ;;  %v300_v10 = vpack.i.bf16 %v99_v7, %v92_v6  ;;  %v305_v14 = vpack.i.bf16 %v85_v13, %v78_v12 }
   0x7   :  { %219 = vmatpush.bf16.msra.mxu1 %v294_v40 }
   0x9   :  { %271 = vmatmul.msk.bf16.vlgmr.msra.gmra.mxu0 %vm54_vm0, %v289_v9  ;;  %v163_v9 = vunpack.c.l.s4 %v322_v8 }
   0xb   :  { %220 = vmatpush.bf16.msra.mxu1 %v293_v50 }
   0xc   :  { %301 = vperm.xlu0 %299, %v300_v10  }
  0x14   :  { %306 = vperm.xlu0 %299, %v305_v14  }
  0x7e   :  { %v302_v15 = vpop.permute.xlu0 %301 }
  0x7f   :  { %v304_v29 = vunpack.i.h.bf16 %v302_v15  ;;  %v303_v30 = vunpack.i.l.bf16 %v302_v15  ;;  %v164_v15 = vunpack.c.0.s8 %v163_v9 }
  0x81   :  { %v113_v36 = vsub.f32 1.0, %v304_v29  ;;  %v112_v37 = vsub.f32 1.0, %v303_v30 }
  0x83   :  { %v117_v46 = vmul.f32 -10000.0, %v113_v36  ;;  %v116_v47 = vmul.f32 -10000.0, %v112_v37 }
  0x86   :  { %v307_v17 = vpop.permute.xlu0 %306  ;;  %v67_v18 = vpop.f32.mrf.mxu0 }
  0x87   :  { %v309_v19 = vunpack.i.h.bf16 %v307_v17  ;;  %v308_v20 = vunpack.i.l.bf16 %v307_v17  ;;  %v68_v21 = vadd.f32 %v312_v16, %v67_v18 }
  0x89   :  { %314 = vtanh.f32 %v68_v21  ;;  %v111_v22 = vsub.f32 1.0, %v309_v19  ;;  %v110_v23 = vsub.f32 1.0, %v308_v20 }
  0x8b   :  { %v115_v24 = vmul.f32 -10000.0, %v111_v22  ;;  %v114_v25 = vmul.f32 -10000.0, %v110_v23  ;;  %v292_v22 = vld [vmem:[%s416_s5] sm:$0xff] }
  0x8c   :  { %221 = vmatpush.bf16.msra.mxu1 %v292_v22  ;;  %v242_v23 = vld [vmem:[%s418_s4] sm:$0x3] }
  0x8e   :  { %v69_v26 = vpop.f32.mrf.mxu0 }
  0x8f   :  { %v315_v27 = vpop.eup %314  ;;  %v70_v28 = vadd.f32 %v312_v16, %v69_v26 }
  0x90   :  { %v106_v31 = vmul.f32 %v315_v27, %v308_v20  ;;  %v107_v32 = vmul.f32 %v315_v27, %v309_v19 }
  0x91   :  { %316 = vtanh.f32 %v70_v28  ;;  %v241_v28 = vand.u32 127, %v79_v0 }
  0x92   :  { %v118_v33 = vadd.f32 %v114_v25, %v106_v31  ;;  %v119_v34 = vadd.f32 %v115_v24, %v107_v32  ;;  %v324_v24 = vmov 0  }
  0x93   :  { %310 = vset.pattern.permute.xlu2 %v324_v24  ;;  %311 = vset.pattern.permute.xlu0 %v324_v24  ;;  %vm252_vm6 = vcmp.eq.s32.totalorder %v241_v28, 4 }
  0x94   :  { %v122_v38 = vsel %vm54_vm0, %v118_v33, -inf  ;;  %v129_v39 = vsel %vm54_vm0, %v119_v34, -inf  ;;  %244 = vperm.xlu2 %310, %v242_v23  }
  0x95   :  { %v123_v41 = vrot.slane %v122_v38, 4  ;;  %v130_v42 = vrot.slane %v129_v39, 4 }
  0x97   :  { %v317_v43 = vpop.eup %316  ;;  %v124_v44 = vmax.f32 %v122_v38, %v123_v41  ;;  %v131_v45 = vmax.f32 %v129_v39, %v130_v42 }
  0x98   :  { %v108_v48 = vmul.f32 %v317_v43, %v303_v30  ;;  %v109_v49 = vmul.f32 %v317_v43, %v304_v29  ;;  %v313_v29 = vld [vmem:[%s417_s6] ss:$0 sm:$0xff] }
  0x99   :  { %v125_v53 = vrot.slane %v124_v44, 2  ;;  %v132_v54 = vrot.slane %v131_v45, 2 }
  0x9a   :  { %v120_v51 = vadd.f32 %v116_v47, %v108_v48  ;;  %v121_v52 = vadd.f32 %v117_v46, %v109_v49 }
  0x9b   :  { %v126_v59 = vmax.f32 %v124_v44, %v125_v53  ;;  %v133_v60 = vmax.f32 %v131_v45, %v132_v54 }
  0x9c   :  { %v136_v55 = vsel %vm54_vm0, %v120_v51, -inf  ;;  %v143_v56 = vsel %vm54_vm0, %v121_v52, -inf }
  0x9d   :  { %v137_v57 = vrot.slane %v136_v55, 4  ;;  %v144_v58 = vrot.slane %v143_v56, 4  ;;  %v127_v2 = vrot.slane %v126_v59, 1  ;;  %v134_v3 = vrot.slane %v133_v60, 1 }
  0x9f   :  { %v138_v61 = vmax.f32 %v136_v55, %v137_v57  ;;  %v145_v62 = vmax.f32 %v143_v56, %v144_v58  ;;  %v128_v10 = vmax.f32 %v126_v59, %v127_v2  ;;  %v135_v11 = vmax.f32 %v133_v60, %v134_v3 }
  0xa1   :  { %v139_v63 = vrot.slane %v138_v61, 2  ;;  %v146_v1 = vrot.slane %v145_v62, 2  ;;  %v155_v17 = vsel %vm154_vm1, %v135_v11, %v128_v10 }
  0xa3   :  { %v140_v4 = vmax.f32 %v138_v61, %v139_v63  ;;  %v147_v5 = vmax.f32 %v145_v62, %v146_v1 }
  0xa5   :  { %v141_v6 = vrot.slane %v140_v4, 1  ;;  %v148_v7 = vrot.slane %v147_v5, 1 }
  0xa7   :  { %v142_v12 = vmax.f32 %v140_v4, %v141_v6  ;;  %v149_v13 = vmax.f32 %v147_v5, %v148_v7 }
  0xa9   :  { %v156_v14 = vsel %vm154_vm1, %v149_v13, %v142_v12 }
  0xaa   :  { %v159_v16 = vrot.slane %v156_v14, 4 }
  0xac   :  { %v161_v18 = vsel %vm160_vm2, %v159_v16, %v155_v17 }
  0xad   :  { %v165_v19 = vperm.slane %v161_v18, %v164_v15 }
  0xaf   :  { %v166_v20 = vrot.slane %v165_v19, 4 }
  0xb1   :  { %v167_v21 = vsel %vm160_vm2, 0.0, %v166_v20 }
  0xb2   :  { %169 = vrot.lane.b32.xlu1 %v167_v21, %s323_s15 }
  0xee   :  { %v245_v30 = vpop.permute.xlu2 %244 }
  0xef   :  { %vm246_vm4 = vcmp.eq.s32.totalorder %v241_v28, %v245_v30 }
 0x124   :  { %v170_v25 = vpop.permute.xlu1 %169 }
 0x125   :  { %v172_v26 = vsel %vm54_vm0, %v165_v19, %v170_v25 }
 0x126   :  { %v173_v27 = vpack.c.bf16 %v172_v26, %v172_v26 }
 0x128   :  { %288 = vmatmul.msk.bf16.vlgmr.msra.gmra.mxu1 %vm210_vm3, %v173_v27 }
 0x1a5   :  { %v223_v31 = vpop.f32.mrf.mxu1 }
 0x1a6   :  { %v224_v32 = vadd.f32 %v313_v29, %v223_v31 }
 0x1a8   :  { %v228_v33 = vsel %vm227_vm5, %v224_v32, -inf  ;;  %v247_v34 = vsel %vm246_vm4, %v224_v32, 0.0 }
 0x1a9   :  { %229 = vmax.xlane.f32.xlu1 %v228_v33  ;;  %v248_v35 = vsel %vm227_vm5, %v247_v34, 0.0 }
 0x1aa   :  { %249 = vadd.xlane.f32.xlu0 %v248_v35 }
 0x1ad   :  { %v225_v36 = vpop.f32.mrf.mxu1 }
 0x21c   :  { %v230_v37 = vpop.xlane.xlu1 %229 }
 0x21d   :  { %v231_v38 = vsub.f32 %v224_v32, %v230_v37  ;;  %v250_v45 = vpop.xlane.xlu0 %249 }
 0x21f   :  { %v232_v39 = vmul.f32 1.442695, %v231_v38 }
 0x221   :  { %318 = vpow2.f32 %v232_v39 }
 0x227   :  { %v319_v0 = vpop.eup %318 }
 0x228   :  { %v234_v40 = vsel %vm227_vm5, %v319_v0, 0.0 }
 0x229   :  { %235 = vadd.xlane.f32.xlu2 %v234_v40 }
 0x29c   :  { %v236_v41 = vpop.xlane.xlu2 %235 }
 0x29d   :  { %320 = vlog2.f32 %v236_v41 }
 0x2a3   :  { %v321_v42 = vpop.eup %320 }
 0x2a4   :  { %v238_v43 = vmul.f32 0.6931472, %v321_v42 }
 0x2a6   :  { %v239_v44 = vadd.f32 %v238_v43, %v230_v37 }
 0x2a8   :  { %v251_v46 = vsub.f32 %v239_v44, %v250_v45 }
 0x2aa   :  { %v253_v47 = vsel %vm252_vm6, %v251_v46, %v224_v32 }
 0x2ab   :  { %254 = vst [vmem:[%s419_s7] sm:$0x3] %v253_v47 }

</bundles_post_ra>
